<compile_context>
chip_gen: v5e
topology: v5e:2x2
jax: 0.10.0
libtpu: 0.0.40
codegen_flags: <defaults>
</compile_context>

<pallas_src>
import jax
import jax.numpy as jnp
from jax.experimental import pallas as pl
from jax.experimental.pallas import tpu as pltpu


def monotonic_head_kernel(x_ref, w1_ref, b1_ref, w2_ref, b2_ref, out_ref):
    # x_ref : [TB, C, S]  (native NCHW layout, S = H*W on the lane axis)
    # w1_ref: [C, H1]  b1_ref: [1, H1]
    # w2_ref: [H1, K]  b2_ref: [1, K]
    # out_ref: [TB, K]
    x = x_ref[...]

    # AdaptiveMaxPool2d(1) == global max over all spatial positions (lane axis).
    pooled = jnp.max(x, axis=-1)  # [TB, C]

    # fc[0]: Linear(C -> C//3) + ReLU
    h = jnp.dot(pooled, w1_ref[...], preferred_element_type=jnp.float32)
    h = jnp.maximum(h + b1_ref[...], 0.0)

    # fc[2]: Linear(C//3 -> num_classes)
    out = jnp.dot(h, w2_ref[...], preferred_element_type=jnp.float32)
    out_ref[...] = (out + b2_ref[...]).astype(out_ref.dtype)


def _pick_batch_tile(B, C, S, dtype_bytes=4, tile_budget_bytes=16 * 1024 * 1024):
    """Largest divisor of B whose double-buffered tile fits the budget.

    Prefers multiples of 8 (MXU / sublane granularity). Budget chosen to fit
    comfortably inside v7x's 64 MiB VMEM with 2-deep input buffering.
    """
    per_row = C * S * dtype_bytes
    max_tb = max(1, tile_budget_bytes // (2 * per_row))
    best = 1
    for tb in range(1, B + 1):
        if B % tb == 0 and tb <= max_tb:
            best = tb
    mult8 = [tb for tb in range(8, B + 1, 8) if B % tb == 0 and tb <= max_tb]
    if mult8:
        best = max(mult8)
    return best


def monotonic_forward(features_nchw, w1, b1, w2, b2):
    """features_nchw: [B, C, H, W] float32 (output of the frozen backbone)."""
    B, C, H, W = features_nchw.shape
    S = H * W
    H1 = w1.shape[1]
    K = w2.shape[1]

    # Free view: keep native NCHW layout, just collapse the spatial dims.
    x = features_nchw.reshape(B, C, S)

    # Biases kept 2-D for TPU-friendly layouts.
    b1_2d = b1.reshape(1, H1)
    b2_2d = b2.reshape(1, K)

    TB = _pick_batch_tile(B, C, S)
    grid = (B // TB,)

    # VMEM: double-buffered input tile + resident weights + output tile + slack.
    tile_bytes = TB * C * S * 4
    param_bytes = (C * H1 + H1 + H1 * K + K) * 4
    vmem_needed = 2 * tile_bytes + 2 * param_bytes + 2 * (TB * K * 4)
    vmem_limit = min(max(vmem_needed + (2 << 20), 8 << 20), 48 << 20)

    cost = pl.CostEstimate(
        flops=2 * B * (C * H1 + H1 * K),
        transcendentals=0,
        bytes_accessed=B * C * S * 4 + param_bytes + B * K * 4,
    )

    out = pl.pallas_call(
        monotonic_head_kernel,
        out_shape=jax.ShapeDtypeStruct((B, K), jnp.float32),
        grid=grid,
        in_specs=[
            pl.BlockSpec((TB, C, S), lambda b: (b, 0, 0)),   # feature-map tile
            pl.BlockSpec((C, H1), lambda b: (0, 0)),         # w1 (resident)
            pl.BlockSpec((1, H1), lambda b: (0, 0)),         # b1 (resident)
            pl.BlockSpec((H1, K), lambda b: (0, 0)),         # w2 (resident)
            pl.BlockSpec((1, K), lambda b: (0, 0)),          # b2 (resident)
        ],
        out_specs=pl.BlockSpec((TB, K), lambda b: (b, 0)),
        compiler_params=pltpu.CompilerParams(
            dimension_semantics=("parallel",),
            vmem_limit_bytes=int(vmem_limit),
        ),
        cost_estimate=cost,
    )(x, w1, b1_2d, w2, b2_2d)
    return out


def reference_forward(features_nchw, w1, b1, w2, b2):
    """Pure-JAX reference mirroring the PyTorch semantics."""
    pooled = jnp.max(features_nchw, axis=(2, 3))           # AdaptiveMaxPool2d(1) + view
    h = jnp.maximum(pooled @ w1 + b1, 0.0)                 # Linear + ReLU
    return h @ w2 + b2                                     # Linear


if __name__ == "__main__":
    key = jax.random.PRNGKey(0)

    # Small synthetic shapes consistent with the module.
    B = 2                 # batch
    C = 48                # in_features (backbone feature channels)
    H = W = 16            # spatial size of the feature map
    hidden = int(C / 3)   # int(in_features / 3) == 16
    num_classes = 3

    k_x, k_w1, k_b1, k_w2, k_b2 = jax.random.split(key, 5)

    # Deterministic parameter init (PyTorch Linear default: U(-1/sqrt(fan_in), +)).
    bound1 = 1.0 / jnp.sqrt(jnp.float32(C))
    w1 = jax.random.uniform(k_w1, (C, hidden), jnp.float32, -bound1, bound1)
    b1 = jax.random.uniform(k_b1, (hidden,), jnp.float32, -bound1, bound1)

    bound2 = 1.0 / jnp.sqrt(jnp.float32(hidden))
    w2 = jax.random.uniform(k_w2, (hidden, num_classes), jnp.float32, -bound2, bound2)
    b2 = jax.random.uniform(k_b2, (num_classes,), jnp.float32, -bound2, bound2)

    # Stand-in for the frozen EfficientNet feature map (NCHW).
    features = jax.random.normal(k_x, (B, C, H, W), jnp.float32)

    out = monotonic_forward(features, w1, b1, w2, b2)
    out = jax.block_until_ready(out)

    ref = reference_forward(features, w1, b1, w2, b2)
    assert out.shape == (B, num_classes)
    assert jnp.allclose(out, ref, atol=1e-5, rtol=1e-5), "mismatch vs JAX reference"

    print("KERNEL_OK")
</pallas_src>

<mosaic_0001>
module attributes {stable_mosaic.version = 11 : i64} {
  func.func @monotonic_head_kernel(%arg0: i32, %arg1: memref<2x48x256xf32, #tpu.memory_space<vmem>>, %arg2: memref<48x16xf32, #tpu.memory_space<vmem>>, %arg3: memref<1x16xf32, #tpu.memory_space<vmem>>, %arg4: memref<16x3xf32, #tpu.memory_space<vmem>>, %arg5: memref<1x3xf32, #tpu.memory_space<vmem>>, %arg6: memref<2x3xf32, #tpu.memory_space<vmem>>) attributes {dimension_semantics = [#tpu.dimension_semantics<parallel>], iteration_bounds = array<i64: 1>, scalar_prefetch = 0 : i64, scratch_operands = 0 : i64, tpu.core_type = #tpu.core_type<tc>, window_params = [{transform_indices = @transform_0, window_bounds = array<i64: 2, 48, 256>}, {pipeline_mode = #tpu.pipeline_mode<synchronous>, transform_indices = @transform_1, window_bounds = array<i64: 48, 16>}, {pipeline_mode = #tpu.pipeline_mode<synchronous>, transform_indices = @transform_2, window_bounds = array<i64: 1, 16>}, {pipeline_mode = #tpu.pipeline_mode<synchronous>, transform_indices = @transform_3, window_bounds = array<i64: 16, 3>}, {pipeline_mode = #tpu.pipeline_mode<synchronous>, transform_indices = @transform_4, window_bounds = array<i64: 1, 3>}, {transform_indices = @transform_5, window_bounds = array<i64: 2, 3>}]} {
    %c0 = arith.constant 0 : index
    %c0_0 = arith.constant 0 : index
    %c0_1 = arith.constant 0 : index
    %0 = vector.load %arg1[%c0, %c0_0, %c0_1] : memref<2x48x256xf32, #tpu.memory_space<vmem>>, vector<2x48x256xf32>
    %cst = arith.constant dense<0xFF800000> : vector<2x48xf32>
    %1 = vector.multi_reduction <maximumf>, %0, %cst [2] : vector<2x48x256xf32> to vector<2x48xf32>
    %c0_2 = arith.constant 0 : index
    %c0_3 = arith.constant 0 : index
    %2 = vector.load %arg2[%c0_2, %c0_3] : memref<48x16xf32, #tpu.memory_space<vmem>>, vector<48x16xf32>
    %cst_4 = arith.constant dense<0.000000e+00> : vector<2x16xf32>
    %3 = tpu.matmul %1, %2, %cst_4 {dimension_numbers = #tpu.dot_dimension_numbers<[1], [0], [0], [1], [0, 0, 1, 1], [], []>} : vector<2x48xf32>, vector<48x16xf32>, vector<2x16xf32> -> vector<2x16xf32>
    %c0_5 = arith.constant 0 : index
    %c0_6 = arith.constant 0 : index
    %4 = vector.load %arg3[%c0_5, %c0_6] : memref<1x16xf32, #tpu.memory_space<vmem>>, vector<1x16xf32>
    %5 = vector.broadcast %4 : vector<1x16xf32> to vector<2x16xf32>
    %6 = arith.addf %3, %5 : vector<2x16xf32>
    %cst_7 = arith.constant 0.000000e+00 : f32
    %7 = vector.broadcast %cst_7 : f32 to vector<2x16xf32>
    %8 = arith.maximumf %6, %7 : vector<2x16xf32>
    %c0_8 = arith.constant 0 : index
    %c0_9 = arith.constant 0 : index
    %9 = vector.load %arg4[%c0_8, %c0_9] : memref<16x3xf32, #tpu.memory_space<vmem>>, vector<16x3xf32>
    %cst_10 = arith.constant dense<0.000000e+00> : vector<2x3xf32>
    %10 = tpu.matmul %8, %9, %cst_10 {dimension_numbers = #tpu.dot_dimension_numbers<[1], [0], [0], [1], [0, 0, 1, 1], [], []>} : vector<2x16xf32>, vector<16x3xf32>, vector<2x3xf32> -> vector<2x3xf32>
    %c0_11 = arith.constant 0 : index
    %c0_12 = arith.constant 0 : index
    %11 = vector.load %arg5[%c0_11, %c0_12] : memref<1x3xf32, #tpu.memory_space<vmem>>, vector<1x3xf32>
    %12 = vector.broadcast %11 : vector<1x3xf32> to vector<2x3xf32>
    %13 = arith.addf %10, %12 : vector<2x3xf32>
    %c0_13 = arith.constant 0 : index
    %c0_14 = arith.constant 0 : index
    %14 = vector.load %arg6[%c0_13, %c0_14] : memref<2x3xf32, #tpu.memory_space<vmem>>, vector<2x3xf32>
    tpu.vector_store %arg6[%c0_13, %c0_14], %13 {strides = array<i32>} : memref<2x3xf32, #tpu.memory_space<vmem>>, vector<2x3xf32>,
    return
  }
  func.func @transform_0(%arg0: i32) -> (i32, i32, i32) {
    %c0_i32 = arith.constant 0 : i32
    %c0_i32_0 = arith.constant 0 : i32
    %c0_i32_1 = arith.constant 0 : i32
    return %arg0, %c0_i32, %c0_i32_0 : i32, i32, i32
  }
  func.func @transform_1(%arg0: i32) -> (i32, i32) {
    %c0_i32 = arith.constant 0 : i32
    %c0_i32_0 = arith.constant 0 : i32
    %c0_i32_1 = arith.constant 0 : i32
    return %c0_i32, %c0_i32_0 : i32, i32
  }
  func.func @transform_2(%arg0: i32) -> (i32, i32) {
    %c0_i32 = arith.constant 0 : i32
    %c0_i32_0 = arith.constant 0 : i32
    %c0_i32_1 = arith.constant 0 : i32
    return %c0_i32, %c0_i32_0 : i32, i32
  }
  func.func @transform_3(%arg0: i32) -> (i32, i32) {
    %c0_i32 = arith.constant 0 : i32
    %c0_i32_0 = arith.constant 0 : i32
    %c0_i32_1 = arith.constant 0 : i32
    return %c0_i32, %c0_i32_0 : i32, i32
  }
  func.func @transform_4(%arg0: i32) -> (i32, i32) {
    %c0_i32 = arith.constant 0 : i32
    %c0_i32_0 = arith.constant 0 : i32
    %c0_i32_1 = arith.constant 0 : i32
    return %c0_i32, %c0_i32_0 : i32, i32
  }
  func.func @transform_5(%arg0: i32) -> (i32, i32) {
    %c0_i32 = arith.constant 0 : i32
    %c0_i32_0 = arith.constant 0 : i32
    return %arg0, %c0_i32 : i32, i32
  }
}

</mosaic_0001>

<bundles_post_ra>
// kernel: tpu_custom_call.1
= control target key start
LH: loop header
LB: loop body
LE: loop exit
PB: predicated region body
PF: predicated region fallthrough
CT: control target
= control target key end

     0   :  { %10 = vsyncpa [#allocation3], 0  ;;  %s364_s0 = inlined_call_operand.hbm [shape: f32[2,48,256], index: 0, kind: input, shape index: {}]   ;;  %s365_s1 = inlined_call_operand.vmem [shape: f32[48,16], index: 1, kind: input, shape index: {}]   ;;  %s366_s2 = inlined_call_operand.vmem [shape: f32[1,16], index: 2, kind: input, shape index: {}]   ;;  %s367_s3 = inlined_call_operand.vmem [shape: f32[16,3], index: 3, kind: input, shape index: {}]   ;;  %s368_s4 = inlined_call_operand.vmem [shape: f32[1,3], index: 4, kind: input, shape index: {}]   ;;  %s369_s5 = inlined_call_operand.hbm [shape: f32[2,3], index: 5, kind: output, shape index: {}]  }
   0x1   :  { %11 = vsyncpa [#allocation4], 0  ;;  %s16_s20 = sshll.u32 %s364_s0, 4  ;;  %s288_s21 = smov [#allocation2]   ;;  %s17_s20 = int_to_ptr.hbm [resolvable:$true] %s16_s20 }
   0x2   :  { %s18_s22 = sshll.u32 %s288_s21, 4  ;;  %s289_s23 = smov 256   ;;  %s19_s22 = int_to_ptr.vmem [resolvable:$true] %s18_s22 }
   0x3   :  { %s290_s24 = smov 16  }
   0x4   :  { %24 = dma.hbm_to_vmem [thread:$0]  %s17_s20, 3072, %s19_s22, [#allocation3], %s289_s23, %s289_s23, %s290_s24  }
   0x5   :  { %284 = dma.done.wait [#allocation3], 3072  }
   0x6   :  { %285 = vsyncadd [#allocation3], 4294964224  ;;  %v49_v0 = vld [vmem:[#allocation2 + $0x60] sm:$0xff]  ;;  %v50_v1 = vld [vmem:[#allocation2 + $0x68] sm:$0xff]  ;;  %v119_v45 = vlaneseq  ;;  %vm124_vm0 = vcmask 130112   ;;  %vm128_vm1 = vcmask 195712  }
   0x7   :  { %v37_v2 = vld [vmem:[#allocation2] sm:$0xff]  ;;  %v79_v3 = vmax.f32 %v49_v0, %v50_v1  ;;  %v38_v4 = vld [vmem:[#allocation2 + $0x8] sm:$0xff]  ;;  %v51_v9 = vld [vmem:[#allocation2 + $0x70] sm:$0xff]  ;;  %vm132_vm2 = vcmask 261312   ;;  %vm136_vm3 = vcmask 326912   ;;  %vm140_vm4 = vcmask 392512  }
   0x8   :  { %v41_v5 = vld [vmem:[#allocation2 + $0x20] sm:$0xff]  ;;  %v42_v6 = vld [vmem:[#allocation2 + $0x28] sm:$0xff]  ;;  %v61_v7 = vmax.f32 %v37_v2, %v38_v4  ;;  %v52_v10 = vld [vmem:[#allocation2 + $0x78] sm:$0xff]  ;;  %v120_v47 = vand.u32 127, %v119_v45  ;;  %vm153_vm5 = vcmask 1041409   ;;  %vm155_vm6 = vcmask 392192  }
   0x9   :  { %v67_v8 = vmax.f32 %v41_v5, %v42_v6  ;;  %80 = vmax.xlane.f32.xlu1 %v79_v3  ;;  %v39_v11 = vld [vmem:[#allocation2 + $0x10] sm:$0xff]  ;;  %v40_v12 = vld [vmem:[#allocation2 + $0x18] sm:$0xff]  ;;  %v53_v13 = vld [vmem:[#allocation2 + $0x80] sm:$0xff]  ;;  %v82_v15 = vmax.f32 %v51_v9, %v52_v10  ;;  %vm185_vm7 = vcmask 130048   ;;  %s291_s18 = smov [#allocation5]   ;;  %vm209_vm8 = vcmask 17408  }
   0xa   :  { %62 = vmax.xlane.f32.xlu0 %v61_v7  ;;  %v54_v14 = vld [vmem:[#allocation2 + $0x88] sm:$0xff]  ;;  %v64_v16 = vmax.f32 %v39_v11, %v40_v12  ;;  %v55_v18 = vld [vmem:[#allocation2 + $0x90] sm:$0xff]  ;;  %v56_v19 = vld [vmem:[#allocation2 + $0x98] sm:$0xff]  ;;  %v122_v50 = vadd.s32 4294967288, %v120_v47  ;;  %v130_v52 = vadd.s32 4294967272, %v120_v47  ;;  %v126_v53 = vadd.s32 4294967280, %v120_v47 }
   0xb   :  { %68 = vmax.xlane.f32.xlu2 %v67_v8  ;;  %v85_v17 = vmax.f32 %v53_v13, %v54_v14  ;;  %v43_v20 = vld [vmem:[#allocation2 + $0x30] sm:$0xff]  ;;  %v44_v21 = vld [vmem:[#allocation2 + $0x38] sm:$0xff]  ;;  %v45_v22 = vld [vmem:[#allocation2 + $0x40] sm:$0xff]  ;;  %v88_v24 = vmax.f32 %v55_v18, %v56_v19  ;;  %v134_v58 = vadd.s32 4294967264, %v120_v47  ;;  %v138_v0 = vadd.s32 4294967256, %v120_v47  ;;  %s216_s19 = sshll.u32 %s291_s18, 4  ;;  %s217_s19 = int_to_ptr.vmem [resolvable:$true] %s216_s19 }
   0xc   :  { %v46_v23 = vld [vmem:[#allocation2 + $0x48] sm:$0xff]  ;;  %v70_v25 = vmax.f32 %v43_v20, %v44_v21  ;;  %v47_v27 = vld [vmem:[#allocation2 + $0x50] sm:$0xff]  ;;  %v48_v28 = vld [vmem:[#allocation2 + $0x58] sm:$0xff] }
   0xd   :  { %v73_v26 = vmax.f32 %v45_v22, %v46_v23  ;;  %v57_v29 = vld [vmem:[#allocation2 + $0xa0] sm:$0xff]  ;;  %v58_v30 = vld [vmem:[#allocation2 + $0xa8] sm:$0xff]  ;;  %v59_v31 = vld [vmem:[#allocation2 + $0xb0] sm:$0xff]  ;;  %v76_v33 = vmax.f32 %v47_v27, %v48_v28 }
   0xe   :  { %v60_v32 = vld [vmem:[#allocation2 + $0xb8] sm:$0xff]  ;;  %v91_v34 = vmax.f32 %v57_v29, %v58_v30  ;;  %v102_v36 = vld [vmem:[%s365_s1 + $0x28] sm:$0xff]  ;;  %v101_v37 = vld [vmem:[%s365_s1 + $0x20] sm:$0xff] }
   0xf   :  { %v94_v35 = vmax.f32 %v59_v31, %v60_v32  ;;  %168 = vmatpush.msra.mxu0 %v102_v36  ;;  %v100_v38 = vld [vmem:[%s365_s1 + $0x18] sm:$0xff]  ;;  %v99_v39 = vld [vmem:[%s365_s1 + $0x10] sm:$0xff]  ;;  %v98_v40 = vld [vmem:[%s365_s1 + $0x8] sm:$0xff] }
  0x10   :  { %v97_v41 = vld [vmem:[%s365_s1] sm:$0xff]  ;;  %v180_v20 = vld [vmem:[%s367_s3 + $0x8] sm:$0xff] }
  0x11   :  { %83 = vmax.xlane.f32.xlu1 %v82_v15  ;;  %169 = vmatpush.msra.mxu0 %v101_v37  ;;  %v179_v21 = vld [vmem:[%s367_s3] sm:$0xff]  ;;  %s218_s3 = sshll.u32 %s369_s5, 4  ;;  %s219_s3 = int_to_ptr.hbm [resolvable:$true] %s218_s3 }
  0x12   :  { %65 = vmax.xlane.f32.xlu0 %v64_v16  ;;  %203 = vmatpush.msra.mxu1 %v180_v20  ;;  %v234_v22 = vld [vmem:[%s366_s2] ss:$0 sm:$0xff] }
  0x13   :  { %86 = vmax.xlane.f32.xlu2 %v85_v17  ;;  %170 = vmatpush.msra.mxu0 %v100_v38 }
  0x14   :  { %204 = vmatpush.msra.mxu1 %v179_v21 }
  0x15   :  { %171 = vmatpush.msra.mxu0 %v99_v39 }
  0x17   :  { %172 = vmatpush.msra.mxu0 %v98_v40 }
  0x19   :  { %89 = vmax.xlane.f32.xlu1 %v88_v24  ;;  %173 = vmatpush.msra.mxu0 %v97_v41 }
  0x1a   :  { %71 = vmax.xlane.f32.xlu0 %v70_v25 }
  0x1b   :  { %74 = vmax.xlane.f32.xlu2 %v73_v26  ;;  %v235_v26 = vld [vmem:[%s368_s4] ss:$0 sm:$0xff] }
  0x21   :  { %77 = vmax.xlane.f32.xlu1 %v76_v33 }
  0x22   :  { %92 = vmax.xlane.f32.xlu0 %v91_v34 }
  0x23   :  { %95 = vmax.xlane.f32.xlu2 %v94_v35 }
  0x7c   :  { %v81_v42 = vpop.xlane.xlu1 %80 }
  0x7d   :  { %v63_v43 = vpop.xlane.xlu0 %62  ;;  %v142_v63 = vperm.slane %v81_v42, %v120_v47 }
  0x7e   :  { %v69_v44 = vpop.xlane.xlu2 %68  ;;  %v121_v55 = vperm.slane %v63_v43, %v120_v47 }
  0x7f   :  { %v127_v62 = vperm.slane %v69_v44, %v126_v53 }
  0x84   :  { %v84_v46 = vpop.xlane.xlu1 %83 }
  0x85   :  { %v66_v48 = vpop.xlane.xlu0 %65  ;;  %v143_v59 = vperm.slane %v84_v46, %v122_v50 }
  0x86   :  { %v87_v49 = vpop.xlane.xlu2 %86  ;;  %v123_v51 = vperm.slane %v66_v48, %v122_v50 }
  0x87   :  { %v145_v1 = vperm.slane %v87_v49, %v126_v53  ;;  %v144_v4 = vsel %vm124_vm0, %v143_v59, %v142_v63 }
  0x88   :  { %v125_v60 = vsel %vm124_vm0, %v123_v51, %v121_v55 }
  0x89   :  { %v129_v2 = vsel %vm128_vm1, %v127_v62, %v125_v60  ;;  %v146_v11 = vsel %vm128_vm1, %v145_v1, %v144_v4 }
  0x8c   :  { %v90_v54 = vpop.xlane.xlu1 %89 }
  0x8d   :  { %v72_v56 = vpop.xlane.xlu0 %71  ;;  %v147_v5 = vperm.slane %v90_v54, %v130_v52 }
  0x8e   :  { %v75_v57 = vpop.xlane.xlu2 %74  ;;  %v131_v61 = vperm.slane %v72_v56, %v130_v52 }
  0x8f   :  { %v135_v3 = vperm.slane %v75_v57, %v134_v58  ;;  %v148_v15 = vsel %vm132_vm2, %v147_v5, %v146_v11 }
  0x90   :  { %v133_v6 = vsel %vm132_vm2, %v131_v61, %v129_v2 }
  0x91   :  { %v137_v12 = vsel %vm136_vm3, %v135_v3, %v133_v6 }
  0x94   :  { %v78_v7 = vpop.xlane.xlu1 %77 }
  0x95   :  { %v139_v8 = vperm.slane %v78_v7, %v138_v0  ;;  %v93_v9 = vpop.xlane.xlu0 %92 }
  0x96   :  { %v96_v10 = vpop.xlane.xlu2 %95  ;;  %v149_v13 = vperm.slane %v93_v9, %v134_v58 }
  0x97   :  { %v151_v14 = vperm.slane %v96_v10, %v138_v0  ;;  %v141_v16 = vsel %vm140_vm4, %v139_v8, %v137_v12 }
  0x98   :  { %v150_v17 = vsel %vm136_vm3, %v149_v13, %v148_v15 }
  0x99   :  { %v152_v18 = vsel %vm140_vm4, %v151_v14, %v150_v17 }
  0x9a   :  { %v154_v19 = vsel %vm153_vm5, %v152_v18, %v141_v16 }
  0x9b   :  { %228 = vmatmul.msk.f32.vlgmr.msra.gmra.mxu0 %vm155_vm6, %v154_v19 }
 0x118   :  { %v175_v23 = vpop.f32.mrf.mxu0 }
 0x119   :  { %v176_v24 = vadd.f32 %v234_v22, %v175_v23 }
 0x11b   :  { %v178_v25 = vmax.f32 %v176_v24, 0.0 }
 0x11d   :  { %229 = vmatmul.msk.f32.vlgmr.msra.gmra.mxu1 %vm185_vm7, %v178_v25 }
 0x19a   :  { %v206_v27 = vpop.f32.mrf.mxu1 }
 0x19b   :  { %v207_v28 = vadd.f32 %v235_v26, %v206_v27 }
 0x19d   :  { %210 = vst.msk [vmem:[#allocation5] sm:$0x3] %vm209_vm8, %v207_v28 }
 0x19e   :  { %221 = dma.vmem_to_hbm [thread:$0]  %s217_s19, 32, %s219_s3, [#allocation4]  }
 0x19f   :  { %286 = dma.done.wait [#allocation4], 32  }
 0x1a0   :  { %287 = vsyncadd [#allocation4], 4294967264 }
 0x1a1   :  { %226 = vsyncpa [#allocation3], 1 }
 0x1a2   :  { %227 = vsyncpa [#allocation4], 1 }

</bundles_post_ra>
